<compile_context>
chip_gen: v6e
topology: v6e:2x2x1
jax: 0.10.0
libtpu: 0.0.40
codegen_flags: <defaults>
</compile_context>

<pallas_src>
import jax
import jax.numpy as jnp
from jax.experimental import pallas as pl
from jax.experimental.pallas import tpu as pltpu


# ----------------------------- Pallas kernel --------------------------------
def _spatial_graph_conv_kernel(a_ref, x_ref, w_ref, b_ref, o_ref):
    """One (row-tile, time-step) grid point of the fused GCNConv + ReLU.

    a_ref: (TM, N)     row tile of normalized adjacency D^{-1/2}(A+I)D^{-1/2}
    x_ref: (N, Cin)    node features at time step t
    w_ref: (Cin, Cout) shared GCN weight
    b_ref: (1, Cout)   bias
    o_ref: (TM, Cout)  output rows for (time t, row tile)
    """
    # (A @ X_t) first: the N^2 matmul contracts the narrow Cin slab.
    ax = jnp.dot(a_ref[...], x_ref[...], preferred_element_type=jnp.float32)   # (TM, Cin)
    z = jnp.dot(ax, w_ref[...], preferred_element_type=jnp.float32)            # (TM, Cout)
    o_ref[...] = jnp.maximum(z + b_ref[...], 0.0).astype(o_ref.dtype)


def _pick_row_tile(n_nodes):
    """Largest multiple-of-8 divisor of N that is <= 256 (keeps each A row tile
    well inside scoped VMEM on v5e/v6e/v7x for large N); fall back to full N."""
    for tm in (256, 128, 64, 32, 16, 8):
        if n_nodes % tm == 0:
            return tm
    return n_nodes


def spatial_graph_conv_pallas(a_hat, x_tnc, weight, bias):
    """a_hat: (N, N), x_tnc: (T, N, Cin), weight: (Cin, Cout), bias: (Cout,)
    -> (T, N, Cout)."""
    n_t, n_nodes, c_in = x_tnc.shape
    c_out = weight.shape[1]
    tm = _pick_row_tile(n_nodes)
    bias2d = bias.reshape(1, c_out)

    # True flop count: adjacency term contracts Cin (not T*Cout / kron zeros).
    flops = 2 * n_t * n_nodes * n_nodes * c_in + 2 * n_t * n_nodes * c_in * c_out
    bytes_accessed = 4 * (a_hat.size + x_tnc.size + weight.size + bias2d.size
                          + n_t * n_nodes * c_out)

    return pl.pallas_call(
        _spatial_graph_conv_kernel,
        out_shape=jax.ShapeDtypeStruct((n_t, n_nodes, c_out), x_tnc.dtype),
        grid=(n_nodes // tm, n_t),
        in_specs=[
            pl.BlockSpec((tm, n_nodes), lambda i, t: (i, 0)),             # A row tile
            pl.BlockSpec((None, n_nodes, c_in), lambda i, t: (t, 0, 0)),  # X_t
            pl.BlockSpec((c_in, c_out), lambda i, t: (0, 0)),             # W (resident)
            pl.BlockSpec((1, c_out), lambda i, t: (0, 0)),                # bias (resident)
        ],
        out_specs=pl.BlockSpec((None, tm, c_out), lambda i, t: (t, i, 0)),
        compiler_params=pltpu.CompilerParams(
            dimension_semantics=("parallel", "parallel")),
        cost_estimate=pl.CostEstimate(
            flops=int(flops), transcendentals=0, bytes_accessed=int(bytes_accessed)),
    )(a_hat, x_tnc, weight, bias2d)


# ------------------------------ JAX glue -------------------------------------
def build_normalized_adjacency(edge_index, edge_attr, n_nodes):
    """Dense D^{-1/2}(A + I)D^{-1/2} matching PyG GCNConv.gcn_norm defaults.

    A_dense[dst, src] = edge weight; self-loops of weight 1.0 are added only for
    nodes that do NOT already have an explicit self-loop
    (add_remaining_self_loops semantics); deg[i] = sum_j A_dense[i, j].
    """
    src = edge_index[0]
    dst = edge_index[1]
    a = jnp.zeros((n_nodes, n_nodes), jnp.float32)
    a = a.at[dst, src].add(edge_attr.astype(jnp.float32))
    has_self = jnp.zeros((n_nodes,), jnp.float32).at[dst].max(
        jnp.where(src == dst, 1.0, 0.0))
    a = a + jnp.diag(1.0 - has_self)
    deg = jnp.sum(a, axis=1)
    dinv_sqrt = jnp.where(deg > 0, 1.0 / jnp.sqrt(deg), 0.0)
    return dinv_sqrt[:, None] * a * dinv_sqrt[None, :]


def spatial_graph_conv(x_nct, edge_index, edge_attr, weight, bias):
    """x_nct: (N, Cin, T) -> (N, Cout, T), matching the PyTorch module."""
    n_nodes = x_nct.shape[0]
    a_hat = build_normalized_adjacency(edge_index, edge_attr, n_nodes)
    # (N, Cin, T) -> (T, N, Cin): one transpose; no kron / tile / reshape needed.
    x_tnc = jnp.transpose(x_nct, (2, 0, 1))
    y_tnc = spatial_graph_conv_pallas(a_hat, x_tnc, weight, bias)   # (T, N, Cout)
    # Consumers that accept the (T, N, Cout) layout can skip this final transpose.
    return jnp.transpose(y_tnc, (1, 2, 0))                          # (N, Cout, T)


def spatial_graph_conv_ref(x_nct, edge_index, edge_attr, weight, bias):
    """Pure-JAX reference (per-timestep loop, like the PyTorch module)."""
    N, Cin, T = x_nct.shape
    a_hat = build_normalized_adjacency(edge_index, edge_attr, N)
    outs = []
    for t in range(T):
        x_t = x_nct[:, :, t]
        y_t = a_hat @ (x_t @ weight) + bias[None, :]
        outs.append(jnp.maximum(y_t, 0.0))
    return jnp.stack(outs, axis=2)


# ------------------------------- main -----------------------------------------
if __name__ == "__main__":
    # Small shapes consistent with the module's (N, Cin, T) forward convention.
    N_SPATIAL = 16      # nodes
    N_TEMPORAL = 8      # temporal steps
    C_IN = 4
    C_OUT = 32

    key = jax.random.PRNGKey(0)
    k_x, k_w, k_e = jax.random.split(key, 3)

    # Deterministic input features (N, Cin, T).
    x = jax.random.normal(k_x, (N_SPATIAL, C_IN, N_TEMPORAL), dtype=jnp.float32)

    # Deterministic ring graph (bidirectional) with positive edge weights.
    idx = jnp.arange(N_SPATIAL)
    src = jnp.concatenate([idx, (idx + 1) % N_SPATIAL])
    dst = jnp.concatenate([(idx + 1) % N_SPATIAL, idx])
    edge_index = jnp.stack([src, dst], axis=0)                       # (2, E)
    edge_attr = jax.random.uniform(k_e, (edge_index.shape[1],),
                                   minval=0.5, maxval=1.5, dtype=jnp.float32)

    # GCNConv parameters: Glorot-uniform weight (Cin, Cout), zero bias.
    limit = (6.0 / (C_IN + C_OUT)) ** 0.5
    weight = jax.random.uniform(k_w, (C_IN, C_OUT),
                                minval=-limit, maxval=limit, dtype=jnp.float32)
    bias = jnp.zeros((C_OUT,), dtype=jnp.float32)

    out = spatial_graph_conv(x, edge_index, edge_attr, weight, bias)
    out = jax.block_until_ready(out)

    ref = spatial_graph_conv_ref(x, edge_index, edge_attr, weight, bias)
    assert out.shape == (N_SPATIAL, C_OUT, N_TEMPORAL)
    assert jnp.allclose(out, ref, atol=1e-5, rtol=1e-5)

    print("KERNEL_OK")
</pallas_src>

<mosaic_0001>
module attributes {stable_mosaic.version = 11 : i64} {
  func.func @_spatial_graph_conv_kernel(%arg0: i32, %arg1: i32, %arg2: memref<16x16xf32, #tpu.memory_space<vmem>>, %arg3: memref<1x16x4xf32, #tpu.memory_space<vmem>>, %arg4: memref<4x32xf32, #tpu.memory_space<vmem>>, %arg5: memref<1x32xf32, #tpu.memory_space<vmem>>, %arg6: memref<1x16x32xf32, #tpu.memory_space<vmem>>) attributes {dimension_semantics = [#tpu.dimension_semantics<parallel>, #tpu.dimension_semantics<parallel>], iteration_bounds = array<i64: 1, 8>, scalar_prefetch = 0 : i64, scratch_operands = 0 : i64, tpu.core_type = #tpu.core_type<tc>, window_params = [{transform_indices = @transform_0, window_bounds = array<i64: 16, 16>}, {transform_indices = @transform_1, window_bounds = array<i64: 1, 16, 4>}, {pipeline_mode = #tpu.pipeline_mode<synchronous>, transform_indices = @transform_2, window_bounds = array<i64: 4, 32>}, {pipeline_mode = #tpu.pipeline_mode<synchronous>, transform_indices = @transform_3, window_bounds = array<i64: 1, 32>}, {transform_indices = @transform_4, window_bounds = array<i64: 1, 16, 32>}]} {
    %c0 = arith.constant 0 : index
    %c0_0 = arith.constant 0 : index
    %0 = vector.load %arg2[%c0, %c0_0] : memref<16x16xf32, #tpu.memory_space<vmem>>, vector<16x16xf32>
    %c0_1 = arith.constant 0 : index
    %c0_2 = arith.constant 0 : index
    %c0_3 = arith.constant 0 : index
    %1 = vector.load %arg3[%c0_1, %c0_2, %c0_3] : memref<1x16x4xf32, #tpu.memory_space<vmem>>, vector<1x16x4xf32>
    %2 = vector.shape_cast %1 : vector<1x16x4xf32> to vector<16x4xf32>
    %cst = arith.constant dense<0.000000e+00> : vector<16x4xf32>
    %3 = tpu.matmul %0, %2, %cst {dimension_numbers = #tpu.dot_dimension_numbers<[1], [0], [0], [1], [0, 0, 1, 1], [], []>} : vector<16x16xf32>, vector<16x4xf32>, vector<16x4xf32> -> vector<16x4xf32>
    %c0_4 = arith.constant 0 : index
    %c0_5 = arith.constant 0 : index
    %4 = vector.load %arg4[%c0_4, %c0_5] : memref<4x32xf32, #tpu.memory_space<vmem>>, vector<4x32xf32>
    %cst_6 = arith.constant dense<0.000000e+00> : vector<16x32xf32>
    %5 = tpu.matmul %3, %4, %cst_6 {dimension_numbers = #tpu.dot_dimension_numbers<[1], [0], [0], [1], [0, 0, 1, 1], [], []>} : vector<16x4xf32>, vector<4x32xf32>, vector<16x32xf32> -> vector<16x32xf32>
    %c0_7 = arith.constant 0 : index
    %c0_8 = arith.constant 0 : index
    %6 = vector.load %arg5[%c0_7, %c0_8] : memref<1x32xf32, #tpu.memory_space<vmem>>, vector<1x32xf32>
    %7 = vector.broadcast %6 : vector<1x32xf32> to vector<16x32xf32>
    %8 = arith.addf %5, %7 : vector<16x32xf32>
    %cst_9 = arith.constant 0.000000e+00 : f32
    %9 = vector.broadcast %cst_9 : f32 to vector<16x32xf32>
    %10 = arith.maximumf %8, %9 : vector<16x32xf32>
    %c0_10 = arith.constant 0 : index
    %c0_11 = arith.constant 0 : index
    %c0_12 = arith.constant 0 : index
    %11 = vector.load %arg6[%c0_10, %c0_11, %c0_12] : memref<1x16x32xf32, #tpu.memory_space<vmem>>, vector<1x16x32xf32>
    %12 = vector.shape_cast %11 : vector<1x16x32xf32> to vector<16x32xf32>
    %13 = vector.shape_cast %10 : vector<16x32xf32> to vector<1x16x32xf32>
    tpu.vector_store %arg6[%c0_10, %c0_11, %c0_12], %13 {strides = array<i32>} : memref<1x16x32xf32, #tpu.memory_space<vmem>>, vector<1x16x32xf32>,
    return
  }
  func.func @transform_0(%arg0: i32, %arg1: i32) -> (i32, i32) {
    %c0_i32 = arith.constant 0 : i32
    %c0_i32_0 = arith.constant 0 : i32
    return %arg0, %c0_i32 : i32, i32
  }
  func.func @transform_1(%arg0: i32, %arg1: i32) -> (i32, i32, i32) {
    %c0_i32 = arith.constant 0 : i32
    %c0_i32_0 = arith.constant 0 : i32
    %c0_i32_1 = arith.constant 0 : i32
    return %arg1, %c0_i32, %c0_i32_0 : i32, i32, i32
  }
  func.func @transform_2(%arg0: i32, %arg1: i32) -> (i32, i32) {
    %c0_i32 = arith.constant 0 : i32
    %c0_i32_0 = arith.constant 0 : i32
    %c0_i32_1 = arith.constant 0 : i32
    return %c0_i32, %c0_i32_0 : i32, i32
  }
  func.func @transform_3(%arg0: i32, %arg1: i32) -> (i32, i32) {
    %c0_i32 = arith.constant 0 : i32
    %c0_i32_0 = arith.constant 0 : i32
    %c0_i32_1 = arith.constant 0 : i32
    return %c0_i32, %c0_i32_0 : i32, i32
  }
  func.func @transform_4(%arg0: i32, %arg1: i32) -> (i32, i32, i32) {
    %c0_i32 = arith.constant 0 : i32
    %c0_i32_0 = arith.constant 0 : i32
    return %arg1, %arg0, %c0_i32 : i32, i32, i32
  }
}

</mosaic_0001>

<bundles_post_ra>
// kernel: tpu_custom_call.1
= control target key start
LH: loop header
LB: loop body
LE: loop exit
PB: predicated region body
PF: predicated region fallthrough
CT: control target
= control target key end

     0   :  { %9 = vsyncpa [#allocation3], 0  ;;  %s852_s0 = inlined_call_operand.vmem [shape: f32[16,16], index: 0, kind: input, shape index: {}]   ;;  %s853_s1 = inlined_call_operand.vmem [shape: f32[8,16,4], index: 1, kind: input, shape index: {}]   ;;  %s854_s2 = inlined_call_operand.vmem [shape: f32[4,32], index: 2, kind: input, shape index: {}]   ;;  %s855_s3 = inlined_call_operand.vmem [shape: f32[1,32], index: 3, kind: input, shape index: {}]   ;;  %s856_s4 = inlined_call_operand.hbm [shape: f32[8,16,32], index: 4, kind: output, shape index: {}]  }
   0x1   :  { %11 = vsyncpa [#allocation3 + $0x1], 0  ;;  %s726_s15 = smov 0   ;;  %s728_s16 = smov 0  }
   0x2   :  { %s730_s17 = smov 0   ;;  %s732_s18 = smov 0  }
   0x3   :  { %s734_s19 = smov 0   ;;  %s736_s20 = smov 0  }
   0x4 LB: > { %s522_s21 = sadd.s32 4294967295, %s696_s20   ;;  %s523_s22 = sadd.s32 4294967294, %s696_s20   ;;  %s696_s20 = sphi %s736_s20, %s17_s20   ;;  %s692_s19 = sphi %s734_s19, %s863_s19   ;;  %s688_s18 = sphi %s732_s18, %s862_s18   ;;  %s684_s17 = sphi %s730_s17, %s861_s17   ;;  %s680_s16 = sphi %s728_s16, %s860_s16   ;;  %s676_s15 = sphi %s726_s15, %s859_s15  }
   0x5   : > { %s26_s23 = sadd.s32 1, %s692_s19  ;;  %s132_s24 = sadd.s32 1, %s684_s17 }
   0x6   : > { %p27_p0 = scmp.ge.s32.totalorder %s26_s23, 8  ;;  %p142_p1 = scmp.ne.s32.totalorder %s684_s17, %s680_s16 }
   0x7   : > { %p143_p2 = scmp.eq.s32.totalorder %s522_s21, 7  ;;  %p148_p3 = scmp.ne.s32.totalorder %s680_s16, %s676_s15 }
   0x8   : > { %s865_s23 = smov (%p27_p0, %s26_s23), 0  ;;  %p149_p5 = scmp.eq.s32.totalorder %s523_s22, 7 }
   0x9   : > { %p766_p4 = por %p143_p2, %p142_p1  ;;  %s127_s26 = ssub.s32 %s692_s19, %s865_s23 }
   0xa   : > { %p527_p6 = scmp.ge.s32.totalorder %s696_s20, 1  ;;  %p130_p7 = scmp.eq.s32.totalorder %s127_s26, 0 }
   0xb   : > { %p773_p8 = por %p149_p5, %p148_p3  ;;  %p190_p9 = scmp.lt.s32.totalorder %s696_s20, 9 }
   0xc   : > { %s779_s28 = scalar_select %p130_p7, %s684_s17, %s132_s24  }
   0xd   : > { %p191_p10 = pnand %p527_p6, %p190_p9 }
   0xe   : > { %p227_p11 = scmp.lt.s32.totalorder (!%p191_p10), %s688_s18, 7  ;;  %s218_s14 = sand.u32 (!%p191_p10), 1, %s680_s16  }
   0xf   : > { %194 = sbr.rel (%p191_p10) target bundleno = 438 (0x1b6), region = 36  ;;  %s528_s21 = sshll.u32 (!%p191_p10), %s218_s14, 4 }
  0x10   : > { %s220_s26 = scalar_lea.vmem (!%p191_p10), [#allocation2], %s528_s21  ;;  %s543_s30 = sshll.u32 (!%p191_p10), %s688_s18, 8 }
  0x11   : > { %s434_s29 = sshll.u32 (!%p191_p10), %s220_s26, 4  ;;  %s805_s7 = scalar_lea.hbm (!%p191_p10), %s856_s4, %s543_s30  ;;  %s800_s29 = int_to_ptr.vmem [resolvable:$true] %s434_s29 }
  0x12   : > { %s807_s8 = scalar_lea.sflag (!%p191_p10), [#allocation3], %s218_s14 }
  0x14   : > { %v233_v0 = vld [vmem:[%s852_s0] sm:$0xff]  ;;  %vm237_vm0 = vcmask 130048   ;;  %s228_s5 = scalar_select %p227_p11, %s688_s18, 7  ;;  %v234_v3 = vld [vmem:[%s852_s0 + $0x8] sm:$0xff]  ;;  %vm334_vm1 = vcmask 1043456   ;;  %vm327_vm2 = vcmask 31744  }
  0x15   : > { %555 = vmatprep.mubr.msk.f32.mxu0 %vm237_vm0, %v233_v0  ;;  %v319_v4 = vld [vmem:[%s854_s2] sm:$0xf]  ;;  %vm415_vm3 = vcmask 261120   ;;  %s620_s18 = scalar_lea.vmem %s800_s29, 256 }
  0x16   : > { %s542_s6 = sshll.u32 %s228_s5, 4  ;;  %558 = vmatprep.subr.msk.mxu1 %vm334_vm1, %v319_v4  ;;  %v533_v7 = vld [vmem:[%s855_s3] ss:$0 sm:$0xff]  ;;  %p621_p12 = scmp.ne.s32.totalorder %s800_s29, %s620_s18 }
  0x17   : > { %s231_s9 = scalar_lea.vmem %s853_s1, %s542_s6  ;;  %559 = vmatpush3.msk.msra.mxu1 %vm334_vm1, %v319_v4 }
  0x18   : > { %v236_v1 = vld [vmem:[%s231_s9 + $0x8] sm:$0xff]  ;;  %v235_v2 = vld [vmem:[%s231_s9] sm:$0xff]  ;;  %p622_p13 = pnand %p621_p12, %p766_p4  ;;  %s698_s9 = smov [#allocation2]  }
  0x19   : > { %551 = vmatprep.subr.mxu0 %v236_v1  ;;  %s624_s10 = sshll.u32 %s698_s9, 4  ;;  %s625_s10 = int_to_ptr.vmem [resolvable:$false] %s624_s10 }
  0x1a   : > { %552 = vmatpush3.msra.mxu0 %v236_v1  ;;  %p623_p0 = pneg %p622_p13  ;;  %s626_s11 = scalar_lea.vmem %s625_s10, 512 }
  0x1b   : > { %553 = vmatprep.subr.mxu0 %v235_v2  ;;  %p627_p1 = scmp.lt.s32.totalorder %s800_s29, %s625_s10  ;;  %p628_p2 = scmp.lt.s32.totalorder %s626_s11, %s620_s18 }
  0x1c   : > { %554 = vmatpush3.msra.mxu0 %v235_v2 }
  0x1d   : > { %556 = vmatmul.mubr.msk.f32.vlgmr.msra.gmra.mxu0 %vm237_vm0, %v234_v3  ;;  %p629_p3 = por %p628_p2, %p627_p1 }
  0x1f   : > { %p630_p5 = pnand %p629_p3, %p623_p0 }
  0xdd   : > { %v557_v5 = vpop.f32.mrf.mxu0 }
  0xdf   : > { %v310_v6 = vpop.f32.mrf.mxu0 }
  0xe0   : > { %560 = vmatprep.mubr.msk.f32.mxu1 %vm327_vm2, %v310_v6 }
  0xe1   : > { %561 = vmatmul.mubr.msk.f32.vlgmr.msra.gmra.mxu1 %vm327_vm2, %v557_v5 }
 0x1a1   : > { %v562_v8 = vpop.f32.mrf.mxu1 }
 0x1a2   : > { %v410_v9 = vadd.f32 %v562_v8, %v533_v7 }
 0x1a3   : > { %v404_v10 = vpop.f32.mrf.mxu1 }
 0x1a4   : > { %v414_v11 = vmax.f32 %v410_v9, 0.0  ;;  %v405_v12 = vadd.f32 %v533_v7, %v404_v10 }
 0x1a6   : > { %417 = vst.msk [vmem:[%s220_s26 + $0x8] sm:$0xff] %vm415_vm3, %v414_v11  ;;  %v413_v13 = vmax.f32 %v405_v12, 0.0 }
 0x1a8   : > { %416 = vst.msk [vmem:[%s220_s26] sm:$0xff] %vm415_vm3, %v413_v13 }
 0x1a9   : > { %633 = shalt.err (!%p630_p5)
}
 0x1aa   : > { %s634_s12 = scalar_lea.hbm %s805_s7, 256  ;;  %s638_s21 = scalar_lea.hbm %s856_s4, 2048 }
 0x1ab   : > { %p635_p6 = scmp.ne.s32.totalorder %s805_s7, %s634_s12  ;;  %p639_p10 = scmp.lt.s32.totalorder %s805_s7, %s856_s4 }
 0x1ac   : > { %p640_p11 = scmp.lt.s32.totalorder %s638_s21, %s634_s12 }
 0x1ad   : > { %p636_p7 = pnand %p635_p6, %p766_p4 }
 0x1ae   : > { %p641_p12 = por %p640_p11, %p639_p10 }
 0x1af   : > { %p637_p9 = pneg %p636_p7 }
 0x1b1   : > { %p642_p13 = pnand %p641_p12, %p637_p9 }
 0x1b3   : > { %645 = shalt.err (!%p642_p13)
}
 0x1b4   : > { %s699_s26 = smov 128   ;;  %s700_s30 = smov 8  }
 0x1b5   : > { %563 = dma.vmem_to_hbm [thread:$0]  (%p766_p4), %s800_s29, 256, %s805_s7, %s807_s8, %s699_s26, %s699_s26, %s700_s30  }
 0x1b6 PF: > { %p569_p0 = scmp.ge.s32.totalorder %s696_s20, 2  ;;  %s449_s5 = sand.u32 1, %s676_s15  }
 0x1b7   : > { %s450_s6 = scalar_lea.sflag [#allocation3], %s449_s5 }
 0x1b8   : > { %p566_p1 = pnand %p569_p0, %p773_p8 }
 0x1ba   : > { %p567_p2 = pneg %p566_p1 }
 0x1bc   : > { %671 = dma.done.wait (%p567_p2), %s450_s6, 256  }
 0x1bd   : > { %673 = vsyncadd (%p567_p2), %s450_s6, 4294967040  ;;  %s17_s20 = sadd.s32 1, %s696_s20   ;;  %s859_s15 = smov %s680_s16 }
 0x1be   : > { %p14_p3 = scmp.ge.s32.totalorder %s17_s20, 10   ;;  %s860_s16 = smov %s684_s17 }
 0x1bf   : > { %s861_s17 = smov %s779_s28  ;;  %s862_s18 = smov %s692_s19 }
 0x1c0   : > { %s863_s19 = smov %s865_s23  ;;  %16 = sbr.rel (!%p14_p3) target bundleno = 4 (0x4), region = 74 }
 0x1c5   :  { %455 = vsyncpa [#allocation3], 1 }
 0x1c6   :  { %457 = vsyncpa [#allocation3 + $0x1], 1 }

</bundles_post_ra>
